<compile_context>
chip_gen: v7x
topology: tpu7x:2x2x1
jax: 0.10.0
libtpu: 0.0.40
codegen_flags: <defaults>
</compile_context>

<pallas_src>
import functools

import jax
import jax.numpy as jnp
from jax.experimental import pallas as pl
from jax.experimental.pallas import tpu as pltpu

LN_EPS = 1e-5  # nn.LayerNorm default


def _round_up(x, m):
    return ((x + m - 1) // m) * m


def _cdiv(a, b):
    return -(-a // b)


def _sublane(dtype):
    # Minimum sublane multiple for the second-to-last dim: 8 (f32), 16 (bf16),
    # 32 (int8/fp8).
    return max(8, 32 // jnp.dtype(dtype).itemsize)


def _gelu_tanh(x):
    # tanh-approximate GELU (EUP-friendly).
    # TODO(synk): PyTorch nn.GELU() default is the exact erf formulation; the
    # tanh approximation differs by <1e-3 absolute.
    c = jnp.float32(0.7978845608028654)  # sqrt(2/pi)
    return 0.5 * x * (1.0 + jnp.tanh(c * (x + 0.044715 * x * x * x)))


@functools.lru_cache(maxsize=1)
def _vmem_cap_bytes():
    """Generation-aware VMEM budget: ~80% of physical, with a safe fallback."""
    try:
        return int(pltpu.get_tpu_info().vmem_capacity_bytes * 0.8)
    except Exception:
        return 48 * 1024 * 1024  # fits every generation, including v7x (64 MiB)


def _prenorm_ff_kernel(x_ref, gamma_ref, beta_ref, w1_ref, b1_ref, w2_ref,
                       b2_ref, o_ref, y_scr, acc_scr, *, d_real):
    j = pl.program_id(1)  # hidden-dim tile index (reduction axis)

    @pl.when(j == 0)
    def _():
        # ---- LayerNorm over the real D lanes, computed once per row tile ----
        x = x_ref[...].astype(jnp.float32)              # (tm, Dp)
        d_pad = x.shape[-1]
        inv_d = jnp.float32(1.0 / d_real)
        if d_real == d_pad:
            mean = jnp.mean(x, axis=-1, keepdims=True)
            xc = x - mean
        else:
            lane = jax.lax.broadcasted_iota(jnp.int32, x.shape, dimension=1)
            mask = lane < d_real
            mean = jnp.sum(x, axis=-1, keepdims=True) * inv_d  # pads are zero
            xc = jnp.where(mask, x - mean, 0.0)
        var = jnp.sum(xc * xc, axis=-1, keepdims=True) * inv_d
        inv = jax.lax.rsqrt(var + LN_EPS)
        y_scr[...] = xc * inv * gamma_ref[...] + beta_ref[...]
        acc_scr[...] = jnp.zeros_like(acc_scr)

    # ---- fn: FeedForward over one hidden tile, f32 accumulation ----
    mm_dtype = w1_ref.dtype                             # f32 or bf16 operands
    y = y_scr[...].astype(mm_dtype)                     # (tm, Dp)
    h = jnp.dot(y, w1_ref[...],
                preferred_element_type=jnp.float32) + b1_ref[...]
    h = _gelu_tanh(h)                                   # (tm, tH)
    acc_scr[...] += jnp.dot(h.astype(mm_dtype), w2_ref[...],
                            preferred_element_type=jnp.float32)

    @pl.when(j == pl.num_programs(1) - 1)
    def _():
        o_ref[...] = (acc_scr[...] + b2_ref[...]).astype(o_ref.dtype)


@functools.lru_cache(maxsize=None)
def _build_prenorm_ff_call(rows_p, Dp, Hp, tH, tm, d_real, x_dtype_name,
                           wdt_name, vmem_limit):
    grid_m = rows_p // tm
    grid_h = Hp // tH
    x_dtype = jnp.dtype(x_dtype_name)
    wdt = jnp.dtype(wdt_name)

    # Advisory cost estimate for XLA's scheduler.
    flops = 4 * rows_p * Dp * Hp                       # two matmuls
    transcendentals = rows_p * Hp                      # tanh in GELU
    bytes_accessed = (2 * rows_p * Dp * x_dtype.itemsize
                      + grid_m * 2 * Dp * Hp * wdt.itemsize
                      + (3 * Dp + Hp) * 4)

    return pl.pallas_call(
        functools.partial(_prenorm_ff_kernel, d_real=d_real),
        out_shape=jax.ShapeDtypeStruct((rows_p, Dp), x_dtype),
        grid_spec=pltpu.PrefetchScalarGridSpec(
            num_scalar_prefetch=0,
            grid=(grid_m, grid_h),                      # reduction axis last
            in_specs=[
                pl.BlockSpec((tm, Dp), lambda i, j: (i, 0)),   # x row tile
                pl.BlockSpec((1, Dp), lambda i, j: (0, 0)),    # LN gamma
                pl.BlockSpec((1, Dp), lambda i, j: (0, 0)),    # LN beta
                pl.BlockSpec((Dp, tH), lambda i, j: (0, j)),   # W1 h-tile
                pl.BlockSpec((1, tH), lambda i, j: (0, j)),    # b1 h-tile
                pl.BlockSpec((tH, Dp), lambda i, j: (j, 0)),   # W2 h-tile
                pl.BlockSpec((1, Dp), lambda i, j: (0, 0)),    # b2
            ],
            out_specs=pl.BlockSpec((tm, Dp), lambda i, j: (i, 0)),
            scratch_shapes=[
                pltpu.VMEM((tm, Dp), jnp.float32),   # cached LayerNorm output
                pltpu.VMEM((tm, Dp), jnp.float32),   # second-matmul accumulator
            ],
        ),
        compiler_params=pltpu.CompilerParams(
            dimension_semantics=("parallel", "arbitrary"),
            vmem_limit_bytes=vmem_limit),
        cost_estimate=pl.CostEstimate(flops=flops,
                                      transcendentals=transcendentals,
                                      bytes_accessed=bytes_accessed),
    )


def prepare_prenorm_ff_params(gamma, beta, w1, b1, w2, b2, *,
                              matmul_dtype=None, th=512):
    """Pad / cast parameters once (hoisted out of the per-call hot path).

    matmul_dtype=jnp.bfloat16 enables bf16 MXU operands (LN stats, biases and
    accumulation stay f32). th is the target hidden-dim tile (multiple of 128).
    """
    D, H = w1.shape
    wdt = jnp.dtype(matmul_dtype if matmul_dtype is not None else w1.dtype)

    Dp = _round_up(D, 128)
    Hp0 = _round_up(H, 128)
    th = max(128, min(_round_up(th, 128), Hp0))
    grid_h = _cdiv(Hp0, th)
    tH = _round_up(_cdiv(Hp0, grid_h), 128)
    Hp = grid_h * tH

    params = dict(
        gamma=jnp.pad(gamma.reshape(1, D).astype(jnp.float32),
                      ((0, 0), (0, Dp - D))),
        beta=jnp.pad(beta.reshape(1, D).astype(jnp.float32),
                     ((0, 0), (0, Dp - D))),
        w1=jnp.pad(w1, ((0, Dp - D), (0, Hp - H))).astype(wdt),
        b1=jnp.pad(b1.reshape(1, H).astype(jnp.float32), ((0, 0), (0, Hp - H))),
        w2=jnp.pad(w2, ((0, Hp - H), (0, Dp - D))).astype(wdt),
        b2=jnp.pad(b2.reshape(1, D).astype(jnp.float32), ((0, 0), (0, Dp - D))),
    )
    meta = dict(D=D, H=H, Dp=Dp, Hp=Hp, tH=tH, wdt=wdt)
    return params, meta


def prenorm_feedforward(x, params, meta, *, tm=512):
    """x: (B, N, D) -> (B, N, D). params/meta from prepare_prenorm_ff_params."""
    B, N, D = x.shape
    assert D == meta["D"], "feature dim mismatch with prepared params"
    Dp, Hp, tH = meta["Dp"], meta["Hp"], meta["tH"]
    rows = B * N

    # Row tile: large enough to amortize per-grid-step overhead, rounded to
    # the input dtype's sublane multiple, never larger than the problem.
    sub = _sublane(x.dtype)
    tm = max(sub, min(_round_up(tm, sub), _round_up(rows, sub)))
    rows_p = _round_up(rows, tm)

    x2 = jnp.pad(x.reshape(rows, D), ((0, rows_p - rows), (0, Dp - D)))

    # VMEM footprint estimate (double-buffered pipelined operands + scratch),
    # capped at ~80% of the chip's physical VMEM.
    isz_x = jnp.dtype(x.dtype).itemsize
    isz_w = meta["wdt"].itemsize
    est = (4 * Dp * tH * isz_w                 # W1 + W2 h-tiles, double-buffered
           + 2 * (3 * Dp + tH) * 4             # gamma/beta/b1/b2 blocks
           + 4 * tm * Dp * isz_x               # x + out blocks
           + 2 * tm * Dp * 4                   # LN cache + accumulator scratch
           + tm * tH * 4)                      # f32 h intermediate
    vmem_limit = int(min(max(2 * est, 32 * 1024 * 1024), _vmem_cap_bytes()))

    call = _build_prenorm_ff_call(rows_p, Dp, Hp, tH, tm, D,
                                  jnp.dtype(x.dtype).name, meta["wdt"].name,
                                  vmem_limit)
    out2 = call(x2, params["gamma"], params["beta"], params["w1"],
                params["b1"], params["w2"], params["b2"])
    return out2[:rows, :D].reshape(B, N, D)


def prenorm_feedforward_ref(x, gamma, beta, w1, b1, w2, b2):
    mean = jnp.mean(x, axis=-1, keepdims=True)
    var = jnp.mean((x - mean) ** 2, axis=-1, keepdims=True)
    y = (x - mean) * jax.lax.rsqrt(var + LN_EPS) * gamma.reshape(-1) \
        + beta.reshape(-1)
    h = _gelu_tanh(y @ w1 + b1.reshape(-1))
    return h @ w2 + b2.reshape(-1)


if __name__ == "__main__":
    key = jax.random.PRNGKey(0)
    kx, kw1, kb1, kw2, kb2 = jax.random.split(key, 5)

    # ---- Case 1: small H (single hidden tile), f32 parity with reference ----
    B, N, D, H = 2, 8, 32, 64
    x = jax.random.normal(kx, (B, N, D), dtype=jnp.float32)

    gamma = jnp.ones((1, D), dtype=jnp.float32)   # nn.LayerNorm init
    beta = jnp.zeros((1, D), dtype=jnp.float32)
    w1 = jax.random.normal(kw1, (D, H), dtype=jnp.float32) * 0.05
    b1 = jax.random.normal(kb1, (1, H), dtype=jnp.float32) * 0.01
    w2 = jax.random.normal(kw2, (H, D), dtype=jnp.float32) * 0.05
    b2 = jax.random.normal(kb2, (1, D), dtype=jnp.float32) * 0.01

    ref = prenorm_feedforward_ref(x, gamma, beta, w1, b1, w2, b2)

    params, meta = prepare_prenorm_ff_params(gamma, beta, w1, b1, w2, b2)
    out = jax.block_until_ready(prenorm_feedforward(x, params, meta))
    assert out.shape == (B, N, D)
    assert jnp.allclose(out, ref, atol=1e-5, rtol=1e-5), "f32 mismatch (case 1)"

    # ---- Case 2: H spanning multiple hidden tiles (exercises accumulator) ----
    H2 = 300
    kw1b, kb1b, kw2b, kb2b = jax.random.split(kw1, 4)
    w1b = jax.random.normal(kw1b, (D, H2), dtype=jnp.float32) * 0.05
    b1b = jax.random.normal(kb1b, (1, H2), dtype=jnp.float32) * 0.01
    w2b = jax.random.normal(kw2b, (H2, D), dtype=jnp.float32) * 0.05
    b2b = jax.random.normal(kb2b, (1, D), dtype=jnp.float32) * 0.01

    ref2 = prenorm_feedforward_ref(x, gamma, beta, w1b, b1b, w2b, b2b)

    params2, meta2 = prepare_prenorm_ff_params(gamma, beta, w1b, b1b, w2b, b2b,
                                               th=128)   # 3 hidden tiles
    out2 = jax.block_until_ready(prenorm_feedforward(x, params2, meta2))
    assert jnp.allclose(out2, ref2, atol=1e-5, rtol=1e-5), "f32 mismatch (case 2)"

    # ---- Case 3: bf16 MXU operands (f32 accumulation), looser tolerance ----
    params3, meta3 = prepare_prenorm_ff_params(gamma, beta, w1b, b1b, w2b, b2b,
                                               matmul_dtype=jnp.bfloat16,
                                               th=128)
    out3 = jax.block_until_ready(prenorm_feedforward(x, params3, meta3))
    assert out3.shape == (B, N, D)
    assert bool(jnp.all(jnp.isfinite(out3)))
    assert float(jnp.max(jnp.abs(out3 - ref2))) < 5e-2, "bf16 mismatch vs reference"

    print("KERNEL_OK")
</pallas_src>

<mosaic_0001>
module attributes {stable_mosaic.version = 11 : i64} {
  func.func @_prenorm_ff_kernel(%arg0: i32, %arg1: i32, %arg2: memref<16x128xf32, #tpu.memory_space<vmem>>, %arg3: memref<1x128xf32, #tpu.memory_space<vmem>>, %arg4: memref<1x128xf32, #tpu.memory_space<vmem>>, %arg5: memref<128x128xf32, #tpu.memory_space<vmem>>, %arg6: memref<1x128xf32, #tpu.memory_space<vmem>>, %arg7: memref<128x128xf32, #tpu.memory_space<vmem>>, %arg8: memref<1x128xf32, #tpu.memory_space<vmem>>, %arg9: memref<16x128xf32, #tpu.memory_space<vmem>>, %arg10: memref<16x128xf32, #tpu.memory_space<vmem>>, %arg11: memref<16x128xf32, #tpu.memory_space<vmem>>) attributes {dimension_semantics = [#tpu.dimension_semantics<parallel>, #tpu.dimension_semantics<arbitrary>], iteration_bounds = array<i64: 1, 1>, scalar_prefetch = 0 : i64, scratch_operands = 2 : i64, tpu.core_type = #tpu.core_type<tc>, window_params = [{transform_indices = @transform_0, window_bounds = array<i64: 16, 128>}, {pipeline_mode = #tpu.pipeline_mode<synchronous>, transform_indices = @transform_1, window_bounds = array<i64: 1, 128>}, {pipeline_mode = #tpu.pipeline_mode<synchronous>, transform_indices = @transform_2, window_bounds = array<i64: 1, 128>}, {transform_indices = @transform_3, window_bounds = array<i64: 128, 128>}, {transform_indices = @transform_4, window_bounds = array<i64: 1, 128>}, {transform_indices = @transform_5, window_bounds = array<i64: 128, 128>}, {pipeline_mode = #tpu.pipeline_mode<synchronous>, transform_indices = @transform_6, window_bounds = array<i64: 1, 128>}, {transform_indices = @transform_7, window_bounds = array<i64: 16, 128>}]} {
    %c0_i32 = arith.constant 0 : i32
    %0 = arith.cmpi eq, %arg1, %c0_i32 : i32
    %1 = arith.extui %0 : i1 to i32
    %c0_i32_0 = arith.constant 0 : i32
    %2 = arith.cmpi ne, %1, %c0_i32_0 : i32
    scf.if %2 {
      %c0_19 = arith.constant 0 : index
      %c0_20 = arith.constant 0 : index
      %30 = vector.load %arg2[%c0_19, %c0_20] : memref<16x128xf32, #tpu.memory_space<vmem>>, vector<16x128xf32>
      %31 = tpu.iota {dimensions = array<i32: 1>} : vector<16x128xi32>
      %c32_i32 = arith.constant 32 : i32
      %32 = vector.broadcast %c32_i32 : i32 to vector<16x128xi32>
      %33 = arith.cmpi slt, %31, %32 : vector<16x128xi32>
      %cst_21 = arith.constant dense<0.000000e+00> : vector<16xf32>
      %34 = vector.multi_reduction <add>, %30, %cst_21 [1] : vector<16x128xf32> to vector<16xf32>
      %35 = vector.shape_cast %34 : vector<16xf32> to vector<16x1xf32>
      %cst_22 = arith.constant 3.125000e-02 : f32
      %36 = vector.broadcast %cst_22 : f32 to vector<16x1xf32>
      %37 = arith.mulf %35, %36 : vector<16x1xf32>
      %38 = vector.broadcast %37 : vector<16x1xf32> to vector<16x128xf32>
      %39 = arith.subf %30, %38 : vector<16x128xf32>
      %cst_23 = arith.constant 0.000000e+00 : f32
      %40 = vector.broadcast %cst_23 : f32 to vector<16x128xf32>
      %41 = arith.select %33, %39, %40 : vector<16x128xi1>, vector<16x128xf32>
      %42 = arith.mulf %41, %41 : vector<16x128xf32>
      %cst_24 = arith.constant dense<0.000000e+00> : vector<16xf32>
      %43 = vector.multi_reduction <add>, %42, %cst_24 [1] : vector<16x128xf32> to vector<16xf32>
      %44 = vector.shape_cast %43 : vector<16xf32> to vector<16x1xf32>
      %cst_25 = arith.constant 3.125000e-02 : f32
      %45 = vector.broadcast %cst_25 : f32 to vector<16x1xf32>
      %46 = arith.mulf %44, %45 : vector<16x1xf32>
      %cst_26 = arith.constant 9.99999974E-6 : f32
      %47 = vector.broadcast %cst_26 : f32 to vector<16x1xf32>
      %48 = arith.addf %46, %47 : vector<16x1xf32>
      %49 = math.rsqrt %48 : vector<16x1xf32>
      %50 = vector.broadcast %49 : vector<16x1xf32> to vector<16x128xf32>
      %51 = arith.mulf %41, %50 : vector<16x128xf32>
      %c0_27 = arith.constant 0 : index
      %c0_28 = arith.constant 0 : index
      %52 = vector.load %arg3[%c0_27, %c0_28] : memref<1x128xf32, #tpu.memory_space<vmem>>, vector<1x128xf32>
      %53 = vector.broadcast %52 : vector<1x128xf32> to vector<16x128xf32>
      %54 = arith.mulf %51, %53 : vector<16x128xf32>
      %c0_29 = arith.constant 0 : index
      %c0_30 = arith.constant 0 : index
      %55 = vector.load %arg4[%c0_29, %c0_30] : memref<1x128xf32, #tpu.memory_space<vmem>>, vector<1x128xf32>
      %56 = vector.broadcast %55 : vector<1x128xf32> to vector<16x128xf32>
      %57 = arith.addf %54, %56 : vector<16x128xf32>
      %c0_31 = arith.constant 0 : index
      %c0_32 = arith.constant 0 : index
      %58 = vector.load %arg10[%c0_31, %c0_32] : memref<16x128xf32, #tpu.memory_space<vmem>>, vector<16x128xf32>
      tpu.vector_store %arg10[%c0_31, %c0_32], %57 {strides = array<i32>} : memref<16x128xf32, #tpu.memory_space<vmem>>, vector<16x128xf32>,
      %cst_33 = arith.constant 0.000000e+00 : f32
      %59 = vector.broadcast %cst_33 : f32 to vector<16x128xf32>
      %c0_34 = arith.constant 0 : index
      %c0_35 = arith.constant 0 : index
      %60 = vector.load %arg11[%c0_34, %c0_35] : memref<16x128xf32, #tpu.memory_space<vmem>>, vector<16x128xf32>
      tpu.vector_store %arg11[%c0_34, %c0_35], %59 {strides = array<i32>} : memref<16x128xf32, #tpu.memory_space<vmem>>, vector<16x128xf32>,
    } else {
    }
    %c0 = arith.constant 0 : index
    %c0_1 = arith.constant 0 : index
    %3 = vector.load %arg10[%c0, %c0_1] : memref<16x128xf32, #tpu.memory_space<vmem>>, vector<16x128xf32>
    %c0_2 = arith.constant 0 : index
    %c0_3 = arith.constant 0 : index
    %4 = vector.load %arg5[%c0_2, %c0_3] : memref<128x128xf32, #tpu.memory_space<vmem>>, vector<128x128xf32>
    %cst = arith.constant dense<0.000000e+00> : vector<16x128xf32>
    %5 = tpu.matmul %3, %4, %cst {dimension_numbers = #tpu.dot_dimension_numbers<[1], [0], [0], [1], [0, 0, 1, 1], [], []>} : vector<16x128xf32>, vector<128x128xf32>, vector<16x128xf32> -> vector<16x128xf32>
    %c0_4 = arith.constant 0 : index
    %c0_5 = arith.constant 0 : index
    %6 = vector.load %arg6[%c0_4, %c0_5] : memref<1x128xf32, #tpu.memory_space<vmem>>, vector<1x128xf32>
    %7 = vector.broadcast %6 : vector<1x128xf32> to vector<16x128xf32>
    %8 = arith.addf %5, %7 : vector<16x128xf32>
    %cst_6 = arith.constant 5.000000e-01 : f32
    %9 = vector.broadcast %cst_6 : f32 to vector<16x128xf32>
    %10 = arith.mulf %9, %8 : vector<16x128xf32>
    %cst_7 = arith.constant 4.471500e-02 : f32
    %11 = vector.broadcast %cst_7 : f32 to vector<16x128xf32>
    %12 = arith.mulf %11, %8 : vector<16x128xf32>
    %13 = arith.mulf %12, %8 : vector<16x128xf32>
    %14 = arith.mulf %13, %8 : vector<16x128xf32>
    %15 = arith.addf %8, %14 : vector<16x128xf32>
    %cst_8 = arith.constant 0.797884583 : f32
    %16 = vector.broadcast %cst_8 : f32 to vector<16x128xf32>
    %17 = arith.mulf %16, %15 : vector<16x128xf32>
    %18 = math.tanh %17 : vector<16x128xf32>
    %cst_9 = arith.constant 1.000000e+00 : f32
    %19 = vector.broadcast %cst_9 : f32 to vector<16x128xf32>
    %20 = arith.addf %19, %18 : vector<16x128xf32>
    %21 = arith.mulf %10, %20 : vector<16x128xf32>
    %c0_10 = arith.constant 0 : index
    %c0_11 = arith.constant 0 : index
    %22 = vector.load %arg11[%c0_10, %c0_11] : memref<16x128xf32, #tpu.memory_space<vmem>>, vector<16x128xf32>
    %c0_12 = arith.constant 0 : index
    %c0_13 = arith.constant 0 : index
    %23 = vector.load %arg7[%c0_12, %c0_13] : memref<128x128xf32, #tpu.memory_space<vmem>>, vector<128x128xf32>
    %cst_14 = arith.constant dense<0.000000e+00> : vector<16x128xf32>
    %24 = tpu.matmul %21, %23, %cst_14 {dimension_numbers = #tpu.dot_dimension_numbers<[1], [0], [0], [1], [0, 0, 1, 1], [], []>} : vector<16x128xf32>, vector<128x128xf32>, vector<16x128xf32> -> vector<16x128xf32>
    %25 = arith.addf %22, %24 : vector<16x128xf32>
    %c0_15 = arith.constant 0 : index
    %c0_16 = arith.constant 0 : index
    %26 = vector.load %arg11[%c0_15, %c0_16] : memref<16x128xf32, #tpu.memory_space<vmem>>, vector<16x128xf32>
    tpu.vector_store %arg11[%c0_15, %c0_16], %25 {strides = array<i32>} : memref<16x128xf32, #tpu.memory_space<vmem>>, vector<16x128xf32>,
    %c0_i32_17 = arith.constant 0 : i32
    %27 = arith.cmpi eq, %arg1, %c0_i32_17 : i32
    %28 = arith.extui %27 : i1 to i32
    %c0_i32_18 = arith.constant 0 : i32
    %29 = arith.cmpi ne, %28, %c0_i32_18 : i32
    scf.if %29 {
      %c0_19 = arith.constant 0 : index
      %c0_20 = arith.constant 0 : index
      %30 = vector.load %arg11[%c0_19, %c0_20] : memref<16x128xf32, #tpu.memory_space<vmem>>, vector<16x128xf32>
      %c0_21 = arith.constant 0 : index
      %c0_22 = arith.constant 0 : index
      %31 = vector.load %arg8[%c0_21, %c0_22] : memref<1x128xf32, #tpu.memory_space<vmem>>, vector<1x128xf32>
      %32 = vector.broadcast %31 : vector<1x128xf32> to vector<16x128xf32>
      %33 = arith.addf %30, %32 : vector<16x128xf32>
      %c0_23 = arith.constant 0 : index
      %c0_24 = arith.constant 0 : index
      %34 = vector.load %arg9[%c0_23, %c0_24] : memref<16x128xf32, #tpu.memory_space<vmem>>, vector<16x128xf32>
      tpu.vector_store %arg9[%c0_23, %c0_24], %33 {strides = array<i32>} : memref<16x128xf32, #tpu.memory_space<vmem>>, vector<16x128xf32>,
    } else {
    }
    return
  }
  func.func @transform_0(%arg0: i32, %arg1: i32) -> (i32, i32) {
    %c0_i32 = arith.constant 0 : i32
    %c0_i32_0 = arith.constant 0 : i32
    return %arg0, %c0_i32 : i32, i32
  }
  func.func @transform_1(%arg0: i32, %arg1: i32) -> (i32, i32) {
    %c0_i32 = arith.constant 0 : i32
    %c0_i32_0 = arith.constant 0 : i32
    %c0_i32_1 = arith.constant 0 : i32
    return %c0_i32, %c0_i32_0 : i32, i32
  }
  func.func @transform_2(%arg0: i32, %arg1: i32) -> (i32, i32) {
    %c0_i32 = arith.constant 0 : i32
    %c0_i32_0 = arith.constant 0 : i32
    %c0_i32_1 = arith.constant 0 : i32
    return %c0_i32, %c0_i32_0 : i32, i32
  }
  func.func @transform_3(%arg0: i32, %arg1: i32) -> (i32, i32) {
    %c0_i32 = arith.constant 0 : i32
    %c0_i32_0 = arith.constant 0 : i32
    return %c0_i32, %arg1 : i32, i32
  }
  func.func @transform_4(%arg0: i32, %arg1: i32) -> (i32, i32) {
    %c0_i32 = arith.constant 0 : i32
    %c0_i32_0 = arith.constant 0 : i32
    return %c0_i32, %arg1 : i32, i32
  }
  func.func @transform_5(%arg0: i32, %arg1: i32) -> (i32, i32) {
    %c0_i32 = arith.constant 0 : i32
    %c0_i32_0 = arith.constant 0 : i32
    return %arg1, %c0_i32 : i32, i32
  }
  func.func @transform_6(%arg0: i32, %arg1: i32) -> (i32, i32) {
    %c0_i32 = arith.constant 0 : i32
    %c0_i32_0 = arith.constant 0 : i32
    %c0_i32_1 = arith.constant 0 : i32
    return %c0_i32, %c0_i32_0 : i32, i32
  }
  func.func @transform_7(%arg0: i32, %arg1: i32) -> (i32, i32) {
    %c0_i32 = arith.constant 0 : i32
    %c0_i32_0 = arith.constant 0 : i32
    return %arg0, %c0_i32 : i32, i32
  }
}

</mosaic_0001>

<bundles_post_ra>
// kernel: tpu_custom_call.1
= control target key start
LH: loop header
LB: loop body
LE: loop exit
PB: predicated region body
PF: predicated region fallthrough
CT: control target
= control target key end

     0   :  { %12 = vsyncpa [#allocation5], 0  ;;  %s779_s0 = inlined_call_operand.hbm [shape: f32[16,128], index: 0, kind: input, shape index: {}]   ;;  %s780_s1 = inlined_call_operand.vmem [shape: f32[1,128], index: 1, kind: input, shape index: {}]   ;;  %s781_s2 = inlined_call_operand.vmem [shape: f32[1,128], index: 2, kind: input, shape index: {}]   ;;  %s782_s3 = inlined_call_operand.hbm [shape: f32[128,128], index: 3, kind: input, shape index: {}]   ;;  %s783_s4 = inlined_call_operand.vmem [shape: f32[1,128], index: 4, kind: input, shape index: {}]   ;;  %s784_s5 = inlined_call_operand.hbm [shape: f32[128,128], index: 5, kind: input, shape index: {}]   ;;  %s785_s6 = inlined_call_operand.vmem [shape: f32[1,128], index: 6, kind: input, shape index: {}]   ;;  %s786_s7 = inlined_call_operand.hbm [shape: f32[16,128], index: 7, kind: output, shape index: {}]  }
   0x1   :  { %13 = vsyncpa [#allocation8], 0 }
   0x2   :  { %14 = vsyncpa [#allocation6], 0  ;;  %s654_s24 = smov [#allocation7]   ;;  %s655_s26 = smov [#allocation4]  }
   0x3   :  { %s36_s25 = sshll.u32 %s654_s24, 4  ;;  %s20_s27 = sshll.u32 %s655_s26, 4  ;;  %s37_s25 = int_to_ptr.vmem [resolvable:$true] %s36_s25  ;;  %s700_s27 = int_to_ptr.vmem [resolvable:$true] %s20_s27 }
   0x4   :  { %s560_s30 = scalar_lea.hbm %s782_s3, 2048 }
   0x5   :  { %p561_p0 = scmp.ne.s32.totalorder %s782_s3, %s560_s30  ;;  %p564_p1 = scmp.lt.u32.totalorder %s560_s30, %s782_s3 }
   0x7   :  { %p566_p2 = pnand %p564_p1, %p561_p0 }
   0x9   :  { %569 = shalt.err (!%p566_p2)
}
   0xa   :  { %s570_s12 = scalar_lea.vmem %s37_s25, 2048  ;;  %p575_p4 = scmp.lt.s32.totalorder %s37_s25, %s37_s25 }
   0xb   :  { %p571_p3 = scmp.ne.s32.totalorder %s37_s25, %s570_s12  ;;  %p576_p5 = scmp.lt.s32.totalorder %s570_s12, %s570_s12 }
   0xd   :  { %p577_p6 = por %p576_p5, %p575_p4 }
   0xf   :  { %p578_p7 = pnand %p577_p6, %p571_p3 }
  0x11   :  { %581 = shalt.err (!%p578_p7)
}
  0x12   :  { %s656_s13 = smov 128   ;;  %s657_s14 = smov 8  }
  0x13   :  { %42 = dma.hbm_to_vmem [thread:$0]  %s782_s3, 2048, %s37_s25, [#allocation8], %s656_s13, %s656_s13, %s657_s14  }
  0x14   :  { %s582_s19 = scalar_lea.hbm %s779_s0, 256 }
  0x15   :  { %p583_p8 = scmp.ne.s32.totalorder %s779_s0, %s582_s19  ;;  %p586_p9 = scmp.lt.u32.totalorder %s582_s19, %s779_s0 }
  0x17   :  { %p588_p10 = pnand %p586_p9, %p583_p8 }
  0x19   :  { %591 = shalt.err (!%p588_p10)
}
  0x1a   :  { %s592_s24 = scalar_lea.vmem %s700_s27, 256  ;;  %p597_p12 = scmp.lt.s32.totalorder %s700_s27, %s700_s27 }
  0x1b   :  { %p593_p11 = scmp.ne.s32.totalorder %s700_s27, %s592_s24  ;;  %p598_p13 = scmp.lt.s32.totalorder %s592_s24, %s592_s24 }
  0x1d   :  { %p599_p0 = por %p598_p13, %p597_p12 }
  0x1f   :  { %p600_p1 = pnand %p599_p0, %p593_p11 }
  0x21   :  { %603 = shalt.err (!%p600_p1)
}
  0x22   :  { %26 = dma.hbm_to_vmem [thread:$0]  %s779_s0, 256, %s700_s27, [#allocation5], %s656_s13, %s656_s13, %s657_s14  }
  0x23   :  { %s658_s26 = smov [#allocation9]   ;;  %s604_s8 = scalar_lea.hbm %s784_s5, 2048 }
  0x24   :  { %s50_s28 = sshll.u32 %s658_s26, 4  ;;  %p605_p2 = scmp.ne.s32.totalorder %s784_s5, %s604_s8  ;;  %s51_s28 = int_to_ptr.vmem [resolvable:$true] %s50_s28 }
  0x25   :  { %p608_p3 = scmp.lt.u32.totalorder %s604_s8, %s784_s5 }
  0x27   :  { %p610_p4 = pnand %p608_p3, %p605_p2 }
  0x29   :  { %613 = shalt.err (!%p610_p4)
}
  0x2a   :  { %s614_s15 = scalar_lea.vmem %s51_s28, 2048  ;;  %p619_p6 = scmp.lt.s32.totalorder %s51_s28, %s51_s28 }
  0x2b   :  { %p615_p5 = scmp.ne.s32.totalorder %s51_s28, %s614_s15  ;;  %p620_p7 = scmp.lt.s32.totalorder %s614_s15, %s614_s15 }
  0x2d   :  { %p621_p8 = por %p620_p7, %p619_p6 }
  0x2f   :  { %p622_p9 = pnand %p621_p8, %p615_p5 }
  0x31   :  { %625 = shalt.err (!%p622_p9)
}
  0x32   :  { %56 = dma.hbm_to_vmem [thread:$0]  %s784_s5, 2048, %s51_s28, [#allocation8], %s656_s13, %s656_s13, %s657_s14  }
  0x33   :  { %648 = dma.done.wait [#allocation5], 256  }
  0x34   :  { %649 = vsyncadd [#allocation5], 4294967040 }
  0x35   :  { %650 = dma.done.wait [#allocation8], 4096  }
  0x36   :  { %651 = vsyncadd [#allocation8], 4294963200  ;;  %v72_v0 = vld [vmem:[#allocation4] sm:$0xff]  ;;  %v73_v1 = vld [vmem:[#allocation4 + $0x8] sm:$0xff]  ;;  %v74_v8 = vlaneseq  ;;  %s659_s20 = smov [#allocation10]  }
  0x37   :  { %77 = vadd.xlane.f32.xlu0 %v72_v0  ;;  %v125_v2 = vld [vmem:[#allocation7] sm:$0xff]  ;;  %v126_v3 = vld [vmem:[#allocation7 + $0x8] sm:$0xff]  ;;  %v127_v4 = vld [vmem:[#allocation7 + $0x10] sm:$0xff]  ;;  %s359_s21 = sshll.u32 %s659_s20, 4  ;;  %s360_s21 = int_to_ptr.vmem [resolvable:$true] %s359_s21 }
  0x38   :  { %v482_v5 = vpack.c.bf16 %v126_v3, %v125_v2  ;;  %v128_v6 = vld [vmem:[#allocation7 + $0x18] sm:$0xff]  ;;  %v75_v9 = vand.u32 127, %v74_v8  ;;  %v129_v20 = vld [vmem:[#allocation7 + $0x20] sm:$0xff]  ;;  %v130_v21 = vld [vmem:[#allocation7 + $0x28] sm:$0xff]  ;;  %s626_s22 = scalar_lea.vmem %s360_s21, 256  ;;  %p631_p11 = scmp.lt.s32.totalorder %s360_s21, %s360_s21 }
  0x39   :  { %v486_v7 = vpack.c.bf16 %v128_v6, %v127_v4  ;;  %v490_v22 = vpack.c.bf16 %v130_v21, %v129_v20  ;;  %v131_v23 = vld [vmem:[#allocation7 + $0x30] sm:$0xff]  ;;  %v132_v24 = vld [vmem:[#allocation7 + $0x38] sm:$0xff]  ;;  %v133_v26 = vld [vmem:[#allocation7 + $0x40] sm:$0xff]  ;;  %p627_p10 = scmp.ne.s32.totalorder %s360_s21, %s626_s22  ;;  %p632_p12 = scmp.lt.s32.totalorder %s626_s22, %s626_s22 }
  0x3a   :  { %483 = vmatprep.subr.bf16.mxu0 %v482_v5  ;;  %vm76_vm0 = vcmp.lt.s32.totalorder %v75_v9, 32  ;;  %v494_v25 = vpack.c.bf16 %v132_v24, %v131_v23  ;;  %v134_v27 = vld [vmem:[#allocation7 + $0x48] sm:$0xff]  ;;  %v135_v29 = vld [vmem:[#allocation7 + $0x50] sm:$0xff]  ;;  %v136_v30 = vld [vmem:[#allocation7 + $0x58] sm:$0xff] }
  0x3b   :  { %79 = vadd.xlane.f32.xlu0 %v73_v1  ;;  %485 = vmatpush3.bf16.msra.mxu0 %v482_v5  ;;  %v498_v28 = vpack.c.bf16 %v134_v27, %v133_v26  ;;  %v137_v31 = vld [vmem:[#allocation7 + $0x60] sm:$0xff]  ;;  %v502_v32 = vpack.c.bf16 %v136_v30, %v135_v29  ;;  %v138_v33 = vld [vmem:[#allocation7 + $0x68] sm:$0xff]  ;;  %v139_v35 = vld [vmem:[#allocation7 + $0x70] sm:$0xff]  ;;  %p633_p13 = por %p632_p12, %p631_p11 }
  0x3c   :  { %487 = vmatprep.subr.bf16.mxu0 %v486_v7  ;;  %v506_v34 = vpack.c.bf16 %v138_v33, %v137_v31  ;;  %v140_v36 = vld [vmem:[#allocation7 + $0x78] sm:$0xff]  ;;  %v243_v38 = vld [vmem:[#allocation9] sm:$0xff]  ;;  %v244_v39 = vld [vmem:[#allocation9 + $0x8] sm:$0xff] }
  0x3d   :  { %v510_v37 = vpack.c.bf16 %v140_v36, %v139_v35  ;;  %v514_v40 = vpack.c.bf16 %v244_v39, %v243_v38  ;;  %v372_v48 = vld [vmem:[%s780_s1] ss:$0 sm:$0xff]  ;;  %v246_v58 = vld [vmem:[#allocation9 + $0x18] sm:$0xff]  ;;  %v247_v60 = vld [vmem:[#allocation9 + $0x20] sm:$0xff]  ;;  %p634_p0 = pnand %p633_p13, %p627_p10 }
  0x3e   :  { %v373_v50 = vld [vmem:[%s781_s2] ss:$0 sm:$0xff]  ;;  %v248_v61 = vld [vmem:[#allocation9 + $0x28] sm:$0xff]  ;;  %v254_v6 = vld [vmem:[#allocation9 + $0x58] sm:$0xff] }
  0x3f   :  { %489 = vmatpush3.bf16.msra.mxu0 %v486_v7  ;;  %515 = vmatprep.subr.bf16.mxu1 %v514_v40  ;;  %v245_v57 = vld [vmem:[#allocation9 + $0x10] sm:$0xff]  ;;  %v522_v62 = vpack.c.bf16 %v248_v61, %v247_v60  ;;  %v252_v3 = vld [vmem:[#allocation9 + $0x48] sm:$0xff]  ;;  %v255_v8 = vld [vmem:[#allocation9 + $0x60] sm:$0xff] }
  0x40   :  { %491 = vmatprep.subr.bf16.mxu0 %v490_v22  ;;  %517 = vmatpush3.bf16.msra.mxu1 %v514_v40  ;;  %v518_v59 = vpack.c.bf16 %v246_v58, %v245_v57  ;;  %v249_v63 = vld [vmem:[#allocation9 + $0x30] sm:$0xff]  ;;  %v256_v9 = vld [vmem:[#allocation9 + $0x68] sm:$0xff] }
  0x41   :  { %v253_v5 = vld [vmem:[#allocation9 + $0x50] sm:$0xff] }
  0x42   :  { %519 = vmatprep.subr.bf16.mxu1 %v518_v59  ;;  %v534_v7 = vpack.c.bf16 %v254_v6, %v253_v5 }
  0x43   :  { %493 = vmatpush3.bf16.msra.mxu0 %v490_v22 }
  0x44   :  { %495 = vmatprep.subr.bf16.mxu0 %v494_v25  ;;  %521 = vmatpush3.bf16.msra.mxu1 %v518_v59 }
  0x45   :  { %523 = vmatprep.subr.bf16.mxu1 %v522_v62 }
  0x47   :  { %497 = vmatpush3.bf16.msra.mxu0 %v494_v25 }
  0x48   :  { %499 = vmatprep.subr.bf16.mxu0 %v498_v28  ;;  %525 = vmatpush3.bf16.msra.mxu1 %v522_v62 }
  0x4b   :  { %501 = vmatpush3.bf16.msra.mxu0 %v498_v28 }
  0x4c   :  { %503 = vmatprep.subr.bf16.mxu0 %v502_v32 }
  0x4f   :  { %505 = vmatpush3.bf16.msra.mxu0 %v502_v32 }
  0x50   :  { %507 = vmatprep.subr.bf16.mxu0 %v506_v34 }
  0x53   :  { %509 = vmatpush3.bf16.msra.mxu0 %v506_v34 }
  0x54   :  { %511 = vmatprep.subr.bf16.mxu0 %v510_v37 }
  0x57   :  { %513 = vmatpush3.bf16.msra.mxu0 %v510_v37  ;;  %v375_v37 = vld [vmem:[%s785_s6] ss:$0 sm:$0xff] }
  0xc4   :  { %v78_v10 = vpop.xlane.xlu0 %77 }
  0xc5   :  { %v81_v11 = vmul.f32 0.03125, %v78_v10  ;;  %v538_v10 = vpack.c.bf16 %v256_v9, %v255_v8 }
  0xc7   :  { %v83_v12 = vsub.f32 %v72_v0, %v81_v11  ;;  %v250_v0 = vld [vmem:[#allocation9 + $0x38] sm:$0xff]  ;;  %v257_v11 = vld [vmem:[#allocation9 + $0x70] sm:$0xff] }
  0xc8   :  { %v80_v13 = vpop.xlane.xlu0 %79  ;;  %v526_v2 = vpack.c.bf16 %v250_v0, %v249_v63 }
  0xc9   :  { %v82_v14 = vmul.f32 0.03125, %v80_v13  ;;  %v85_v15 = vsel %vm76_vm0, %v83_v12, 0.0  ;;  %v258_v12 = vld [vmem:[#allocation9 + $0x78] sm:$0xff] }
  0xca   :  { %v87_v16 = vmul.f32 %v85_v15, %v85_v15  ;;  %527 = vmatprep.subr.bf16.mxu1 %v526_v2  ;;  %v542_v13 = vpack.c.bf16 %v258_v12, %v257_v11 }
  0xcb   :  { %v84_v17 = vsub.f32 %v73_v1, %v82_v14  ;;  %v251_v1 = vld [vmem:[#allocation9 + $0x40] sm:$0xff]  ;;  %529 = vmatpush3.bf16.msra.mxu1 %v526_v2  ;;  %v374_v14 = vld [vmem:[%s783_s4] ss:$0 sm:$0xff] }
  0xcc   :  { %89 = vadd.xlane.f32.xlu1 %v87_v16  ;;  %v530_v4 = vpack.c.bf16 %v252_v3, %v251_v1 }
  0xcd   :  { %v86_v18 = vsel %vm76_vm0, %v84_v17, 0.0 }
  0xce   :  { %v88_v19 = vmul.f32 %v86_v18, %v86_v18  ;;  %531 = vmatprep.subr.bf16.mxu1 %v530_v4 }
  0xcf   :  { %533 = vmatpush3.bf16.msra.mxu1 %v530_v4 }
  0xd0   :  { %91 = vadd.xlane.f32.xlu1 %v88_v19  ;;  %535 = vmatprep.subr.bf16.mxu1 %v534_v7 }
  0xd3   :  { %537 = vmatpush3.bf16.msra.mxu1 %v534_v7 }
  0xd4   :  { %539 = vmatprep.subr.bf16.mxu1 %v538_v10 }
  0xd7   :  { %541 = vmatpush3.bf16.msra.mxu1 %v538_v10 }
  0xd8   :  { %543 = vmatprep.subr.bf16.mxu1 %v542_v13 }
  0xdb   :  { %545 = vmatpush3.bf16.msra.mxu1 %v542_v13 }
 0x159   :  { %v90_v41 = vpop.xlane.xlu1 %89 }
 0x15a   :  { %v93_v42 = vmul.f32 0.03125, %v90_v41 }
 0x15c   :  { %v95_v43 = vadd.f32 1e-05, %v93_v42 }
 0x15d   :  { %v92_v44 = vpop.xlane.xlu1 %91 }
 0x15e   :  { %552 = vrsqrt.f32 %v95_v43  ;;  %v94_v45 = vmul.f32 0.03125, %v92_v44 }
 0x160   :  { %v96_v46 = vadd.f32 1e-05, %v94_v45 }
 0x162   :  { %554 = vrsqrt.f32 %v96_v46 }
 0x168   :  { %v553_v47 = vpop.eup %552 }
 0x169   :  { %v99_v49 = vmul.f32 %v553_v47, %v85_v15 }
 0x16b   :  { %v108_v51 = vmul.f32 %v372_v48, %v99_v49 }
 0x16c   :  { %v555_v52 = vpop.eup %554 }
 0x16d   :  { %v100_v53 = vmul.f32 %v555_v52, %v86_v18  ;;  %v117_v54 = vadd.f32 %v373_v50, %v108_v51 }
 0x16f   :  { %v109_v55 = vmul.f32 %v372_v48, %v100_v53  ;;  %444 = vmatprep.mubr.f32.mxu0 %v117_v54 }
 0x171   :  { %v118_v56 = vadd.f32 %v373_v50, %v109_v55 }
 0x173   :  { %445 = vmatmul.mubr.f32.vlgmr.msra.gmra.mrb[0].mxu0 %v118_v56 }
 0x246   :  { %v446_v15 = vpop.f32.mrb[0].mxu0 }
 0x247   :  { %v220_v16 = vadd.f32 %v446_v15, %v374_v14  ;;  %v214_v17 = vpop.f32.mrb[1].mxu0 }
 0x248   :  { %v215_v18 = vadd.f32 %v374_v14, %v214_v17 }
 0x249   :  { %v226_v19 = vmul.f32 0.044715, %v220_v16  ;;  %v224_v34 = vmul.f32 0.5, %v220_v16 }
 0x24a   :  { %v225_v20 = vmul.f32 0.044715, %v215_v18  ;;  %v223_v32 = vmul.f32 0.5, %v215_v18 }
 0x24b   :  { %v228_v21 = vmul.f32 %v226_v19, %v220_v16 }
 0x24c   :  { %v227_v22 = vmul.f32 %v225_v20, %v215_v18 }
 0x24d   :  { %v230_v23 = vmul.f32 %v228_v21, %v220_v16 }
 0x24e   :  { %v229_v24 = vmul.f32 %v227_v22, %v215_v18 }
 0x24f   :  { %v232_v25 = vadd.f32 %v230_v23, %v220_v16 }
 0x250   :  { %v231_v26 = vadd.f32 %v229_v24, %v215_v18 }
 0x251   :  { %v234_v27 = vmul.f32 0.7978846, %v232_v25 }
 0x252   :  { %v233_v28 = vmul.f32 0.7978846, %v231_v26 }
 0x253   :  { %556 = vtanh.f32 %v234_v27 }
 0x254   :  { %558 = vtanh.f32 %v233_v28 }
 0x25d   :  { %v557_v29 = vpop.eup %556 }
 0x25e   :  { %v559_v30 = vpop.eup %558  ;;  %v238_v31 = vadd.f32 1.0, %v557_v29 }
 0x25f   :  { %v237_v33 = vadd.f32 1.0, %v559_v30 }
 0x260   :  { %v240_v36 = vmul.f32 %v238_v31, %v224_v34 }
 0x261   :  { %v239_v35 = vmul.f32 %v237_v33, %v223_v32 }
 0x263   :  { %479 = vmatprep.mubr.f32.mxu1 %v239_v35 }
 0x264   :  { %480 = vmatmul.mubr.f32.vlgmr.msra.gmra.mrb[0].mxu1 %v240_v36 }
 0x337   :  { %v481_v38 = vpop.f32.mrb[0].mxu1 }
 0x338   :  { %v351_v39 = vadd.f32 %v481_v38, %v375_v37  ;;  %v325_v40 = vpop.f32.mrb[1].mxu1 }
 0x339   :  { %v350_v41 = vadd.f32 %v375_v37, %v325_v40 }
 0x33a   :  { %353 = vst [vmem:[#allocation10 + $0x8] sm:$0xff] %v351_v39 }
 0x33b   :  { %352 = vst [vmem:[#allocation10] sm:$0xff] %v350_v41 }
 0x33c   :  { %637 = shalt.err (!%p634_p0)
}
 0x33d   :  { %s638_s6 = scalar_lea.hbm %s786_s7, 256 }
 0x33e   :  { %p639_p1 = scmp.ne.s32.totalorder %s786_s7, %s638_s6  ;;  %p642_p2 = scmp.lt.u32.totalorder %s638_s6, %s786_s7 }
 0x340   :  { %p644_p3 = pnand %p642_p2, %p639_p1 }
 0x342   :  { %647 = shalt.err (!%p644_p3)
}
 0x343   :  { %365 = dma.vmem_to_hbm [thread:$0]  %s360_s21, 256, %s786_s7, [#allocation6], %s656_s13, %s656_s13, %s657_s14  }
 0x344   :  { %652 = dma.done.wait [#allocation6], 256  }
 0x345   :  { %653 = vsyncadd [#allocation6], 4294967040 }
 0x346   :  { %369 = vsyncpa [#allocation5], 1 }
 0x347   :  { %370 = vsyncpa [#allocation8], 1 }
 0x348   :  { %371 = vsyncpa [#allocation6], 1 }

</bundles_post_ra>
